<compile_context>
chip_gen: v7x
topology: tpu7x:2x2x1
jax: 0.10.0
libtpu: 0.0.40
codegen_flags: <defaults>
</compile_context>

<pallas_src>
import functools

import jax
import jax.numpy as jnp
from jax.experimental import pallas as pl
from jax.experimental.pallas import tpu as pltpu

NUM_LAYERS = 4
HIDDEN = 128          # small lane-dense test size (module default 512 = 4*128 also works)
DEFAULT_TM = 1024     # M-axis tile; 1024+ reaches ~86% of HBM roofline per tile sweeps


def mlp_chain_kernel(x_ref, w_ref, b_ref, o_ref, *, num_layers):
    """Full layer chain on one (TM, D) activation tile.

    x_ref: (TM, D)      f32 activations (one M tile) -- cast to bf16 in-kernel
    w_ref: (L, D, D)    bf16 weights, (in, out) layout -> plain h @ W
    b_ref: (L, 1, D)    f32 biases
    o_ref: (TM, D)      output tile (f32 by default, optionally bf16)
    """
    # Fused f32 -> bf16 cast: saves a full standalone XLA pass over the activations.
    h = x_ref[...].astype(jnp.bfloat16)
    # Short fixed trip count: static unroll keeps everything visible to the scheduler.
    for layer in range(num_layers):
        acc = jnp.dot(h, w_ref[layer], preferred_element_type=jnp.float32)  # MXU, f32 acc
        acc = acc + b_ref[layer]                         # f32 bias, (1, D) broadcast
        if layer + 1 < num_layers:
            h = acc.astype(jnp.bfloat16)                 # bf16 chained activation
        else:
            o_ref[...] = acc.astype(o_ref.dtype)         # store final f32 accumulator directly


def prepare_params(weights, biases):
    """One-time parameter prep (outside the per-call hot path):
    (out, in) nn.Linear weights -> (in, out) MXU layout in bf16; biases stay f32."""
    w_t = jnp.transpose(weights, (0, 2, 1)).astype(jnp.bfloat16)   # (L, D, D) bf16
    b3d = biases[:, None, :].astype(jnp.float32)                   # (L, 1, D) f32
    return w_t, b3d


def _round_up(a, b):
    return ((a + b - 1) // b) * b


@functools.partial(jax.jit, static_argnames=("tm", "out_dtype"))
def mock_model_forward(x, w_t, b3d, *, tm=DEFAULT_TM, out_dtype=None):
    """x: (batch, seq, hidden) f32; w_t/b3d from prepare_params().
    out_dtype=jnp.bfloat16 enables the half-traffic output path; default keeps f32."""
    batch, seq, d = x.shape
    num_layers = w_t.shape[0]
    m = batch * seq
    out_dt = jnp.dtype(out_dtype) if out_dtype is not None else jnp.dtype(x.dtype)

    # M-axis tile: multiple of 8, capped so the grid has >= 2 steps whenever M > 8
    # (both v7x TensorCores get work), and no bigger than `tm`.
    m8 = _round_up(m, 8)
    tm_cap = max(8, _round_up(pl.cdiv(m8, 2), 8))
    tm = max(8, min(tm, tm_cap, m8))
    m_pad = pl.cdiv(m, tm) * tm

    x2d = x.reshape(m, d)                                 # f32; bf16 cast happens in-kernel
    if m_pad != m:                                        # no-op for tile-aligned M
        x2d = jnp.pad(x2d, ((0, m_pad - m), (0, 0)))

    # VMEM budget: double-buffered activation tiles (f32 in, out_dt out),
    # VMEM-resident weights/biases (default double-buffered) + headroom for the
    # per-layer f32/bf16 intermediates. Explicit limit matters on v5e (16 MiB default).
    vmem_bytes = (
        2 * tm * d * 4                      # input tiles (f32, double-buffered)
        + 2 * tm * d * out_dt.itemsize      # output tiles (double-buffered)
        + 2 * num_layers * d * d * 2        # bf16 weights (resident, 2 buffers)
        + 2 * num_layers * d * 4            # f32 biases
        + 4 * tm * d * 4                    # per-layer f32/bf16 intermediates headroom
    )
    vmem_limit = int(min(max(2 * vmem_bytes, 32 * 1024 * 1024), 64 * 1024 * 1024))

    out2d = pl.pallas_call(
        functools.partial(mlp_chain_kernel, num_layers=num_layers),
        out_shape=jax.ShapeDtypeStruct((m_pad, d), out_dt),
        grid=(m_pad // tm,),
        in_specs=[
            pl.BlockSpec((tm, d), lambda i: (i, 0)),                     # activation tiles, pipelined
            pl.BlockSpec((num_layers, d, d), lambda i: (0, 0, 0)),       # weights: VMEM-resident
            pl.BlockSpec((num_layers, 1, d), lambda i: (0, 0, 0)),       # biases:  VMEM-resident
        ],
        out_specs=pl.BlockSpec((tm, d), lambda i: (i, 0)),
        compiler_params=pltpu.CompilerParams(
            dimension_semantics=("parallel",),            # shard M tiles across TCs (v7x megacore)
            vmem_limit_bytes=vmem_limit,
        ),
        cost_estimate=pl.CostEstimate(
            flops=2 * m_pad * d * d * num_layers,
            transcendentals=0,
            bytes_accessed=(m_pad * d * 4                 # f32 activations in
                            + m_pad * d * out_dt.itemsize  # activations out
                            + num_layers * d * d * 2      # bf16 weights
                            + num_layers * d * 4),        # f32 biases
        ),
    )(x2d, w_t, b3d)

    return out2d[:m].reshape(batch, seq, d)


def reference_forward(x, w_t, b3d, out_dtype=None):
    """Same bf16-operand / f32-accumulate math, in plain XLA, for a tight check."""
    batch, seq, d = x.shape
    out_dt = jnp.dtype(out_dtype) if out_dtype is not None else jnp.dtype(x.dtype)
    num_layers = w_t.shape[0]
    h = x.reshape(-1, d).astype(jnp.bfloat16)
    for layer in range(num_layers):
        acc = jnp.dot(h, w_t[layer], preferred_element_type=jnp.float32) + b3d[layer]
        h = acc.astype(jnp.bfloat16) if layer + 1 < num_layers else acc
    return h.astype(out_dt).reshape(batch, seq, d)


if __name__ == "__main__":
    key = jax.random.PRNGKey(0)
    k_x, k_w, k_b = jax.random.split(key, 3)

    batch, seq = 2, 8
    x = jax.random.normal(k_x, (batch, seq, HIDDEN), dtype=jnp.float32)

    # nn.Linear convention: weight (out, in), bias (out,)
    weights = (
        jax.random.normal(k_w, (NUM_LAYERS, HIDDEN, HIDDEN), dtype=jnp.float32)
        * (1.0 / jnp.sqrt(HIDDEN))
    )
    biases = jax.random.normal(k_b, (NUM_LAYERS, HIDDEN), dtype=jnp.float32) * 0.01

    w_t, b3d = prepare_params(weights, biases)            # one-time, outside hot path

    out = mock_model_forward(x, w_t, b3d)
    out = jax.block_until_ready(out)

    ref = reference_forward(x, w_t, b3d)
    assert out.shape == (batch, seq, HIDDEN)
    assert out.dtype == x.dtype
    assert jnp.allclose(out, ref, atol=2e-2, rtol=2e-2), "mismatch vs reference"

    print("KERNEL_OK")
</pallas_src>

<mosaic_0001>
module attributes {stable_mosaic.version = 11 : i64} {
  func.func @mlp_chain_kernel(%arg0: i32, %arg1: memref<8x128xf32, #tpu.memory_space<vmem>>, %arg2: memref<4x128x128xbf16, #tpu.memory_space<vmem>>, %arg3: memref<4x1x128xf32, #tpu.memory_space<vmem>>, %arg4: memref<8x128xf32, #tpu.memory_space<vmem>>) attributes {dimension_semantics = [#tpu.dimension_semantics<parallel>], iteration_bounds = array<i64: 2>, scalar_prefetch = 0 : i64, scratch_operands = 0 : i64, tpu.core_type = #tpu.core_type<tc>, window_params = [{transform_indices = @transform_0, window_bounds = array<i64: 8, 128>}, {pipeline_mode = #tpu.pipeline_mode<synchronous>, transform_indices = @transform_1, window_bounds = array<i64: 4, 128, 128>}, {pipeline_mode = #tpu.pipeline_mode<synchronous>, transform_indices = @transform_2, window_bounds = array<i64: 4, 1, 128>}, {transform_indices = @transform_3, window_bounds = array<i64: 8, 128>}]} {
    %c0 = arith.constant 0 : index
    %c0_0 = arith.constant 0 : index
    %0 = vector.load %arg1[%c0, %c0_0] : memref<8x128xf32, #tpu.memory_space<vmem>>, vector<8x128xf32>
    %1 = arith.truncf %0 : vector<8x128xf32> to vector<8x128xbf16>
    %c0_1 = arith.constant 0 : index
    %c0_2 = arith.constant 0 : index
    %c0_3 = arith.constant 0 : index
    %2 = vector.load %arg2[%c0_1, %c0_2, %c0_3] : memref<4x128x128xbf16, #tpu.memory_space<vmem>>, vector<1x128x128xbf16>
    %3 = vector.shape_cast %2 : vector<1x128x128xbf16> to vector<128x128xbf16>
    %cst = arith.constant dense<0.000000e+00> : vector<8x128xf32>
    %4 = tpu.matmul %1, %3, %cst {dimension_numbers = #tpu.dot_dimension_numbers<[1], [0], [0], [1], [0, 0, 1, 1], [], []>} : vector<8x128xbf16>, vector<128x128xbf16>, vector<8x128xf32> -> vector<8x128xf32>
    %c0_4 = arith.constant 0 : index
    %c0_5 = arith.constant 0 : index
    %c0_6 = arith.constant 0 : index
    %5 = vector.load %arg3[%c0_4, %c0_5, %c0_6] : memref<4x1x128xf32, #tpu.memory_space<vmem>>, vector<1x1x128xf32>
    %6 = vector.shape_cast %5 : vector<1x1x128xf32> to vector<1x128xf32>
    %7 = vector.broadcast %6 : vector<1x128xf32> to vector<8x128xf32>
    %8 = arith.addf %4, %7 : vector<8x128xf32>
    %9 = arith.truncf %8 : vector<8x128xf32> to vector<8x128xbf16>
    %c1 = arith.constant 1 : index
    %c0_7 = arith.constant 0 : index
    %c0_8 = arith.constant 0 : index
    %10 = vector.load %arg2[%c1, %c0_7, %c0_8] : memref<4x128x128xbf16, #tpu.memory_space<vmem>>, vector<1x128x128xbf16>
    %11 = vector.shape_cast %10 : vector<1x128x128xbf16> to vector<128x128xbf16>
    %cst_9 = arith.constant dense<0.000000e+00> : vector<8x128xf32>
    %12 = tpu.matmul %9, %11, %cst_9 {dimension_numbers = #tpu.dot_dimension_numbers<[1], [0], [0], [1], [0, 0, 1, 1], [], []>} : vector<8x128xbf16>, vector<128x128xbf16>, vector<8x128xf32> -> vector<8x128xf32>
    %c1_10 = arith.constant 1 : index
    %c0_11 = arith.constant 0 : index
    %c0_12 = arith.constant 0 : index
    %13 = vector.load %arg3[%c1_10, %c0_11, %c0_12] : memref<4x1x128xf32, #tpu.memory_space<vmem>>, vector<1x1x128xf32>
    %14 = vector.shape_cast %13 : vector<1x1x128xf32> to vector<1x128xf32>
    %15 = vector.broadcast %14 : vector<1x128xf32> to vector<8x128xf32>
    %16 = arith.addf %12, %15 : vector<8x128xf32>
    %17 = arith.truncf %16 : vector<8x128xf32> to vector<8x128xbf16>
    %c2 = arith.constant 2 : index
    %c0_13 = arith.constant 0 : index
    %c0_14 = arith.constant 0 : index
    %18 = vector.load %arg2[%c2, %c0_13, %c0_14] : memref<4x128x128xbf16, #tpu.memory_space<vmem>>, vector<1x128x128xbf16>
    %19 = vector.shape_cast %18 : vector<1x128x128xbf16> to vector<128x128xbf16>
    %cst_15 = arith.constant dense<0.000000e+00> : vector<8x128xf32>
    %20 = tpu.matmul %17, %19, %cst_15 {dimension_numbers = #tpu.dot_dimension_numbers<[1], [0], [0], [1], [0, 0, 1, 1], [], []>} : vector<8x128xbf16>, vector<128x128xbf16>, vector<8x128xf32> -> vector<8x128xf32>
    %c2_16 = arith.constant 2 : index
    %c0_17 = arith.constant 0 : index
    %c0_18 = arith.constant 0 : index
    %21 = vector.load %arg3[%c2_16, %c0_17, %c0_18] : memref<4x1x128xf32, #tpu.memory_space<vmem>>, vector<1x1x128xf32>
    %22 = vector.shape_cast %21 : vector<1x1x128xf32> to vector<1x128xf32>
    %23 = vector.broadcast %22 : vector<1x128xf32> to vector<8x128xf32>
    %24 = arith.addf %20, %23 : vector<8x128xf32>
    %25 = arith.truncf %24 : vector<8x128xf32> to vector<8x128xbf16>
    %c3 = arith.constant 3 : index
    %c0_19 = arith.constant 0 : index
    %c0_20 = arith.constant 0 : index
    %26 = vector.load %arg2[%c3, %c0_19, %c0_20] : memref<4x128x128xbf16, #tpu.memory_space<vmem>>, vector<1x128x128xbf16>
    %27 = vector.shape_cast %26 : vector<1x128x128xbf16> to vector<128x128xbf16>
    %cst_21 = arith.constant dense<0.000000e+00> : vector<8x128xf32>
    %28 = tpu.matmul %25, %27, %cst_21 {dimension_numbers = #tpu.dot_dimension_numbers<[1], [0], [0], [1], [0, 0, 1, 1], [], []>} : vector<8x128xbf16>, vector<128x128xbf16>, vector<8x128xf32> -> vector<8x128xf32>
    %c3_22 = arith.constant 3 : index
    %c0_23 = arith.constant 0 : index
    %c0_24 = arith.constant 0 : index
    %29 = vector.load %arg3[%c3_22, %c0_23, %c0_24] : memref<4x1x128xf32, #tpu.memory_space<vmem>>, vector<1x1x128xf32>
    %30 = vector.shape_cast %29 : vector<1x1x128xf32> to vector<1x128xf32>
    %31 = vector.broadcast %30 : vector<1x128xf32> to vector<8x128xf32>
    %32 = arith.addf %28, %31 : vector<8x128xf32>
    %c0_25 = arith.constant 0 : index
    %c0_26 = arith.constant 0 : index
    %33 = vector.load %arg4[%c0_25, %c0_26] : memref<8x128xf32, #tpu.memory_space<vmem>>, vector<8x128xf32>
    tpu.vector_store %arg4[%c0_25, %c0_26], %32 {strides = array<i32>} : memref<8x128xf32, #tpu.memory_space<vmem>>, vector<8x128xf32>,
    return
  }
  func.func @transform_0(%arg0: i32) -> (i32, i32) {
    %c0_i32 = arith.constant 0 : i32
    %c0_i32_0 = arith.constant 0 : i32
    return %arg0, %c0_i32 : i32, i32
  }
  func.func @transform_1(%arg0: i32) -> (i32, i32, i32) {
    %c0_i32 = arith.constant 0 : i32
    %c0_i32_0 = arith.constant 0 : i32
    %c0_i32_1 = arith.constant 0 : i32
    %c0_i32_2 = arith.constant 0 : i32
    return %c0_i32, %c0_i32_0, %c0_i32_1 : i32, i32, i32
  }
  func.func @transform_2(%arg0: i32) -> (i32, i32, i32) {
    %c0_i32 = arith.constant 0 : i32
    %c0_i32_0 = arith.constant 0 : i32
    %c0_i32_1 = arith.constant 0 : i32
    %c0_i32_2 = arith.constant 0 : i32
    return %c0_i32, %c0_i32_0, %c0_i32_1 : i32, i32, i32
  }
  func.func @transform_3(%arg0: i32) -> (i32, i32) {
    %c0_i32 = arith.constant 0 : i32
    %c0_i32_0 = arith.constant 0 : i32
    return %arg0, %c0_i32 : i32, i32
  }
}

</mosaic_0001>

<bundles_post_ra>
// kernel: mock_model_forward.1
= control target key start
LH: loop header
LB: loop body
LE: loop exit
PB: predicated region body
PF: predicated region fallthrough
CT: control target
= control target key end

     0   :  { %8 = vsyncpa [#allocation3], 0  ;;  %s1426_s0 = inlined_call_operand.hbm [shape: f32[16,128], index: 0, kind: input, shape index: {}]   ;;  %s1427_s1 = inlined_call_operand.hbm [shape: bf16[4,128,128], index: 1, kind: input, shape index: {}]   ;;  %s1428_s2 = inlined_call_operand.vmem [shape: f32[4,1,128], index: 2, kind: input, shape index: {}]   ;;  %s1429_s3 = inlined_call_operand.hbm [shape: f32[16,128], index: 3, kind: output, shape index: {}]  }
   0x1   :  { %10 = vsyncpa [#allocation3 + $0x1], 0 }
   0x2   :  { %11 = vsyncpa [#allocation6], 0 }
   0x3   :  { %12 = vsyncpa [#allocation4], 0 }
   0x4   :  { %14 = vsyncpa [#allocation4 + $0x1], 0  ;;  %s1171_s12 = smov 0   ;;  %s1173_s13 = smov 0  }
   0x5   :  { %s1175_s14 = smov 0   ;;  %s1177_s15 = smov 0  }
   0x6 LB: > { %s1192_s16 = sadd.s32 4294967295, %s1142_s15   ;;  %s752_s17 = sadd.s32 4294967294, %s1142_s15   ;;  %s1142_s15 = sphi %s1177_s15, %s1449_s15   ;;  %s1138_s14 = sphi %s1175_s14, %s1448_s14   ;;  %s1134_s13 = sphi %s1173_s13, %s1447_s13   ;;  %s1130_s12 = sphi %s1171_s12, %s1446_s12  }
   0x7   : > { %p40_p0 = scmp.ne.s32.totalorder %s1134_s13, %s1130_s12  ;;  %p1430_p1 = scmp.eq.s32.totalorder %s1192_s16, 0 }
   0x8   : > { %p112_p3 = scmp.eq.s32.totalorder %s752_s17, 1  ;;  %p753_p5 = scmp.ge.s32.totalorder %s1142_s15, 1 }
   0x9   : > { %p1201_p4 = por %p1430_p1, %p40_p0  ;;  %p119_p7 = scmp.lt.s32.totalorder %s1142_s15, 3 }
   0xa   : > { %p1206_p6 = por %p112_p3, %p40_p0  ;;  %s1144_s21 = smov [#allocation5]  }
   0xb   : > { %s1433_s18 = scalar_select %p1201_p4, 1, 0 }
   0xc   : > { %s1434_s19 = scalar_select %p1206_p6, 1, 0 }
   0xd   : > { %p1211_p8 = pnand %p753_p5, %p119_p7  ;;  %s131_s22 = sshll.u32 %s1144_s21, 4  ;;  %s1215_s22 = int_to_ptr.vmem [resolvable:$true] %s131_s22 }
   0xe   : > { %s1227_s24 = sadd.s32 1, %s1142_s15   ;;  %s27_s25 = sadd.s32 1, %s1138_s14 }
   0xf   : > { %s1435_s20 = scalar_select %p1211_p8, 1, 0 }
  0x10   : > { %p929_p9 = pneg %p1211_p8  ;;  %s24_s26 = ssub.s32 %s1142_s15, %s1227_s24 }
  0x11   : > { %s1014_s29 = scalar_lea.hbm %s1427_s1, 4096 }
  0x12   : > { %p1222_p11 = pnand %p929_p9, %p1430_p1  ;;  %p1015_p12 = scmp.ne.s32.totalorder %s1427_s1, %s1014_s29 }
  0x13   : > { %p1021_p5 = scmp.lt.u32.totalorder %s1014_s29, %s1427_s1 }
  0x14   : > { %p1016_p13 = pneg %p1222_p11 }
  0x16   : > { %p1017_p0 = pnand %p1016_p13, %p1015_p12 }
  0x18   : > { %p1018_p3 = pneg %p1017_p0 }
  0x1a   : > { %p1023_p7 = pnand %p1021_p5, %p1018_p3 }
  0x1c   : > { %1026 = shalt.err (!%p1023_p7)
}
  0x1d   : > { %s1027_s7 = scalar_lea.vmem %s1215_s22, 4096  ;;  %p1035_p2 = scmp.lt.s32.totalorder %s1215_s22, %s1215_s22 }
  0x1e   : > { %p1028_p9 = scmp.ne.s32.totalorder %s1215_s22, %s1027_s7  ;;  %p1036_p6 = scmp.lt.s32.totalorder %s1027_s7, %s1027_s7 }
  0x20   : > { %p1030_p10 = pnand %p1028_p9, %p1016_p13  ;;  %p1037_p4 = por %p1036_p6, %p1035_p2 }
  0x22   : > { %p1031_p1 = pneg %p1030_p10 }
  0x24   : > { %p1038_p8 = pnand %p1037_p4, %p1031_p1 }
  0x26   : > { %1041 = shalt.err (!%p1038_p8)
}
  0x27   : > { %s1145_s8 = smov 64   ;;  %s1146_s9 = smov 4  }
  0x28   : > { %932 = dma.hbm_to_vmem [thread:$0]  (!%p1222_p11), %s1427_s1, 4096, %s1215_s22, [#allocation6], %s1145_s8, %s1145_s8, %s1146_s9  }
  0x29   : > { %p25_p2 = scmp.eq.s32.totalorder %s24_s26, 0  ;;  %p34_p1 = scmp.ne.s32.totalorder %s1138_s14, %s1134_s13 }
  0x2a   : > { %p35_p4 = scmp.eq.s32.totalorder %s1142_s15, 0  ;;  %p942_p6 = scmp.lt.s32.totalorder %s1142_s15, 2 }
  0x2b   : > { %s1258_s17 = scalar_select %p25_p2, %s1138_s14, %s27_s25  }
  0x2c   : > { %p36_p8 = por %p35_p4, %p34_p1  ;;  %p1437_p10 = scmp.eq.s32.totalorder %s1192_s16, 1 }
  0x2d   : > { %s148_s27 = sand.u32 1, %s1138_s14   ;;  %s757_s28 = sshll.u32 %s1142_s15, 7 }
  0x2e   : > { %p1262_p12 = por %p1437_p10, %p34_p1  ;;  %s756_s29 = sshll.u32 %s148_s27, 3 }
  0x2f   : > { %s1271_s4 = scalar_lea.hbm %s1426_s0, %s757_s28  ;;  %s152_s22 = scalar_lea.vmem [#allocation2], %s756_s29 }
  0x30   : > { %s159_s25 = sshll.u32 %s152_s22, 4  ;;  %p1273_p11 = pnand %p942_p6, %p36_p8  ;;  %s1277_s25 = int_to_ptr.vmem [resolvable:$true] %s159_s25 }
  0x31   : > { %s149_s5 = scalar_lea.sflag [#allocation3], %s148_s27  ;;  %s1042_s6 = scalar_lea.hbm %s1271_s4, 128 }
  0x32   : > { %p1043_p13 = scmp.ne.s32.totalorder %s1271_s4, %s1042_s6  ;;  %p1044_p0 = pneg %p1273_p11 }
  0x33   : > { %s1047_s9 = scalar_lea.hbm %s1426_s0, 256  ;;  %p1048_p7 = scmp.lt.u32.totalorder %s1271_s4, %s1426_s0 }
  0x34   : > { %p1045_p3 = pnand %p1044_p0, %p1043_p13  ;;  %p1049_p9 = scmp.lt.u32.totalorder %s1047_s9, %s1042_s6 }
  0x35   : > { %p1051_p1 = scmp.lt.u32.totalorder %s1042_s6, %s1271_s4 }
  0x36   : > { %p1046_p5 = pneg %p1045_p3  ;;  %p1050_p2 = por %p1049_p9, %p1048_p7 }
  0x38   : > { %p1052_p4 = por %p1051_p1, %p1050_p2 }
  0x3a   : > { %p1053_p6 = pnand %p1052_p4, %p1046_p5 }
  0x3c   : > { %1056 = shalt.err (!%p1053_p6)
}
  0x3d   : > { %s1057_s27 = scalar_lea.vmem %s1277_s25, 128  ;;  %s1147_s28 = smov [#allocation2]  }
  0x3e   : > { %p1058_p8 = scmp.ne.s32.totalorder %s1277_s25, %s1057_s27  ;;  %s1062_s29 = sshll.u32 %s1147_s28, 4  ;;  %s1063_s29 = int_to_ptr.vmem [resolvable:$false] %s1062_s29 }
  0x3f   : > { %s1064_s23 = scalar_lea.vmem %s1063_s29, 256  ;;  %p1065_p3 = scmp.lt.s32.totalorder %s1277_s25, %s1063_s29 }
  0x40   : > { %p1060_p10 = pnand %p1058_p8, %p1044_p0  ;;  %p1066_p7 = scmp.lt.s32.totalorder %s1064_s23, %s1057_s27 }
  0x42   : > { %p1061_p13 = pneg %p1060_p10  ;;  %p1067_p9 = por %p1066_p7, %p1065_p3 }
  0x44   : > { %p1068_p2 = pnand %p1067_p9, %p1061_p13 }
  0x46   : > { %1071 = shalt.err (!%p1068_p2)
}
  0x47   : > { %936 = dma.hbm_to_vmem [thread:$0]  (!%p1273_p11), %s1271_s4, 128, %s1277_s25, %s149_s5  }
  0x48   : > { %p1440_p5 = scmp.ne.s32.totalorder %s1435_s20, 0 }
  0x49   : > { %s1307_s30 = sand.u32 (!%p1440_p5), 1, %s1134_s13   ;;  %p1441_p0 = scmp.ne.s32.totalorder (!%p1440_p5), %s1433_s18, 0 }
  0x4a   : > { %168 = sbr.rel (%p1440_p5) target bundleno = 995 (0x3e3), region = 32  ;;  %s759_s22 = sshll.u32 (!%p1440_p5), %s1307_s30, 3 }
  0x4b   : > { %s171_s6 = scalar_lea.sflag (!%p1440_p5), [#allocation3], %s1307_s30  ;;  %s1313_s7 = scalar_lea.vmem (!%p1440_p5), [#allocation2], %s759_s22 }
  0x51   : > { %1117 = dma.done.wait (%p1441_p0), %s171_s6, 128  }
  0x52   : > { %1119 = vsyncadd (%p1441_p0), %s171_s6, 4294967168  ;;  %p1442_p11 = scmp.eq.s32.totalorder %s1192_s16, 0 }
  0x54   : > { %1121 = dma.done.wait (%p1442_p11), [#allocation6], 4096   ;;  %p1443_p1 = pmov %p1442_p11 }
  0x55   : > { %v1148_v0 = vmov 0.0   ;;  %vm1149_vm0 = vmmov 0   ;;  %v982_v1 = vld [vmem:[#allocation5] sm:$0xff]   ;;  %v983_v2 = vld [vmem:[#allocation5 + $0x8] sm:$0xff]   ;;  %v984_v3 = vld [vmem:[#allocation5 + $0x10] sm:$0xff]   ;;  %s802_s10 = sshll.u32 %s1192_s16, 7 }
  0x56   : > { %1123 = vsyncadd (%p1443_p1), [#allocation6], 4294963200  ;;  %841 = vmatprep.subr.bf16.mxu0 %v1148_v0  ;;  %857 = vmatprep.mubr.msk.bf16.mxu0 %vm1149_vm0, %v1148_v0  ;;  %v990_v4 = vld [vmem:[#allocation5 + $0x40] sm:$0xff]   ;;  %v985_v5 = vld [vmem:[#allocation5 + $0x18] sm:$0xff]   ;;  %s200_s11 = scalar_lea.vmem [#allocation7], %s759_s22  ;;  %s1382_s23 = scalar_lea.hbm %s1429_s3, %s802_s10 }
  0x57   : > { %861 = vmatprep.subr.bf16.mxu1 %v1148_v0  ;;  %877 = vmatprep.mubr.msk.bf16.mxu1 %vm1149_vm0, %v1148_v0  ;;  %v991_v6 = vld [vmem:[#allocation5 + $0x48] sm:$0xff]   ;;  %v986_v7 = vld [vmem:[#allocation5 + $0x20] sm:$0xff]   ;;  %v992_v8 = vld [vmem:[#allocation5 + $0x50] sm:$0xff]   ;;  %s672_s27 = sshll.u32 %s200_s11, 4  ;;  %s659_s16 = scalar_lea.sflag [#allocation4], %s1307_s30  ;;  %s1384_s27 = int_to_ptr.vmem [resolvable:$true] %s672_s27 }
  0x58   : > { %842 = vmatpush3.bf16.msra.mxu0 %v982_v1  ;;  %862 = vmatpush3.bf16.msra.mxu1 %v990_v4  ;;  %v987_v9 = vld [vmem:[#allocation5 + $0x28] sm:$0xff]   ;;  %v993_v10 = vld [vmem:[#allocation5 + $0x58] sm:$0xff]   ;;  %v988_v11 = vld [vmem:[#allocation5 + $0x30] sm:$0xff]   ;;  %s1072_s6 = scalar_lea.vmem %s1384_s27, 128  ;;  %s1150_s22 = smov [#allocation7]  }
  0x59   : > { %843 = vmatprep.subr.bf16.mxu0 %v1148_v0  ;;  %863 = vmatprep.subr.bf16.mxu1 %v1148_v0  ;;  %v994_v12 = vld [vmem:[#allocation5 + $0x60] sm:$0xff]   ;;  %v989_v13 = vld [vmem:[#allocation5 + $0x38] sm:$0xff]   ;;  %v995_v15 = vld [vmem:[#allocation5 + $0x68] sm:$0xff]   ;;  %p1073_p4 = scmp.ne.s32.totalorder %s1384_s27, %s1072_s6 }
  0x5a   : > { %v202_v14 = vld [vmem:[%s1313_s7] sm:$0xff]  ;;  %v998_v19 = vld [vmem:[#allocation5 + $0x80] sm:$0xff]   ;;  %v999_v20 = vld [vmem:[#allocation5 + $0x88] sm:$0xff]   ;;  %s1076_s7 = sshll.u32 %s1150_s22, 4  ;;  %s1077_s7 = int_to_ptr.vmem [resolvable:$false] %s1076_s7 }
  0x5b   : > { %v203_v16 = vpack.c.bf16 %v202_v14, %v202_v14  ;;  %v996_v17 = vld [vmem:[#allocation5 + $0x70] sm:$0xff]   ;;  %v997_v18 = vld [vmem:[#allocation5 + $0x78] sm:$0xff]   ;;  %v1002_v23 = vld [vmem:[#allocation5 + $0xa0] sm:$0xff]   ;;  %p1074_p6 = pnand %p1073_p4, %p1262_p12  ;;  %s1078_s18 = scalar_lea.vmem %s1077_s7, 256 }
  0x5c   : > { %844 = vmatpush3.bf16.msra.mxu0 %v983_v2  ;;  %864 = vmatpush3.bf16.msra.mxu1 %v991_v6  ;;  %v1000_v21 = vld [vmem:[#allocation5 + $0x90] sm:$0xff]   ;;  %v1001_v22 = vld [vmem:[#allocation5 + $0x98] sm:$0xff]   ;;  %v1003_v24 = vld [vmem:[#allocation5 + $0xa8] sm:$0xff]   ;;  %p1079_p10 = scmp.lt.s32.totalorder %s1384_s27, %s1077_s7  ;;  %p1080_p13 = scmp.lt.s32.totalorder %s1078_s18, %s1072_s6 }
  0x5d   : > { %845 = vmatprep.subr.bf16.mxu0 %v1148_v0  ;;  %865 = vmatprep.subr.bf16.mxu1 %v1148_v0  ;;  %v1004_v25 = vld [vmem:[#allocation5 + $0xb0] sm:$0xff]   ;;  %v1005_v33 = vld [vmem:[#allocation5 + $0xb8] sm:$0xff]   ;;  %v1006_v34 = vld [vmem:[#allocation5 + $0xc0] sm:$0xff]   ;;  %p1075_p8 = pneg %p1074_p6 }
  0x5e   : > { %v762_v26 = vld [vmem:[%s1428_s2] ss:$0 sm:$0xff]  ;;  %v1007_v35 = vld [vmem:[#allocation5 + $0xc8] sm:$0xff]   ;;  %v1009_v37 = vld [vmem:[#allocation5 + $0xd8] sm:$0xff]   ;;  %p1081_p3 = por %p1080_p13, %p1079_p10 }
  0x5f   : > { %v1008_v36 = vld [vmem:[#allocation5 + $0xd0] sm:$0xff]   ;;  %v1010_v38 = vld [vmem:[#allocation5 + $0xe0] sm:$0xff]   ;;  %v1011_v39 = vld [vmem:[#allocation5 + $0xe8] sm:$0xff]  }
  0x60   : > { %846 = vmatpush3.bf16.msra.mxu0 %v984_v3  ;;  %866 = vmatpush3.bf16.msra.mxu1 %v992_v8  ;;  %v1012_v40 = vld [vmem:[#allocation5 + $0xf0] sm:$0xff]   ;;  %v1013_v48 = vld [vmem:[#allocation5 + $0xf8] sm:$0xff]   ;;  %p1082_p7 = pnand %p1081_p3, %p1075_p8 }
  0x61   : > { %847 = vmatprep.subr.bf16.mxu0 %v1148_v0  ;;  %867 = vmatprep.subr.bf16.mxu1 %v1148_v0  ;;  %v772_v41 = vld [vmem:[%s1428_s2 + $0x1] ss:$0 sm:$0xff]  ;;  %v782_v49 = vld [vmem:[%s1428_s2 + $0x2] ss:$0 sm:$0xff]  ;;  %v792_v56 = vld [vmem:[%s1428_s2 + $0x3] ss:$0 sm:$0xff] }
  0x64   : > { %848 = vmatpush3.bf16.msra.mxu0 %v985_v5  ;;  %868 = vmatpush3.bf16.msra.mxu1 %v993_v10 }
  0x65   : > { %849 = vmatprep.subr.bf16.mxu0 %v1148_v0  ;;  %869 = vmatprep.subr.bf16.mxu1 %v1148_v0 }
  0x68   : > { %850 = vmatpush3.bf16.msra.mxu0 %v986_v7  ;;  %870 = vmatpush3.bf16.msra.mxu1 %v994_v12 }
  0x69   : > { %851 = vmatprep.subr.bf16.mxu0 %v1148_v0  ;;  %871 = vmatprep.subr.bf16.mxu1 %v1148_v0 }
  0x6c   : > { %852 = vmatpush3.bf16.msra.mxu0 %v987_v9  ;;  %872 = vmatpush3.bf16.msra.mxu1 %v995_v15 }
  0x6d   : > { %853 = vmatprep.subr.bf16.mxu0 %v1148_v0  ;;  %873 = vmatprep.subr.bf16.mxu1 %v1148_v0 }
  0x70   : > { %854 = vmatpush3.bf16.msra.mxu0 %v988_v11  ;;  %874 = vmatpush3.bf16.msra.mxu1 %v996_v17 }
  0x71   : > { %855 = vmatprep.subr.bf16.mxu0 %v1148_v0  ;;  %875 = vmatprep.subr.bf16.mxu1 %v1148_v0 }
  0x74   : > { %856 = vmatpush3.bf16.msra.mxu0 %v989_v13  ;;  %876 = vmatpush3.bf16.msra.mxu1 %v997_v18 }
  0x75   : > { %881 = vmatprep.subr.bf16.mxu0 %v1148_v0  ;;  %901 = vmatprep.subr.bf16.mxu1 %v1148_v0 }
  0x77   : > { %858 = vmatmul.mubr.bf16.vlgmr.msra.gmra.mrb[0].mxu0 %v203_v16 }
  0x78   : > { %897 = vmatprep.mubr.msk.bf16.mxu0 %vm1149_vm0, %v1148_v0  ;;  %882 = vmatpush3.bf16.msra.mxu0 %v998_v19 }
  0x79   : > { %883 = vmatprep.subr.bf16.mxu0 %v1148_v0 }
  0x7c   : > { %884 = vmatpush3.bf16.msra.mxu0 %v999_v20 }
  0x7d   : > { %885 = vmatprep.subr.bf16.mxu0 %v1148_v0 }
  0x80   : > { %886 = vmatpush3.bf16.msra.mxu0 %v1000_v21 }
  0x81   : > { %887 = vmatprep.subr.bf16.mxu0 %v1148_v0 }
  0x84   : > { %888 = vmatpush3.bf16.msra.mxu0 %v1001_v22 }
  0x85   : > { %889 = vmatprep.subr.bf16.mxu0 %v1148_v0 }
  0x88   : > { %890 = vmatpush3.bf16.msra.mxu0 %v1002_v23 }
  0x89   : > { %891 = vmatprep.subr.bf16.mxu0 %v1148_v0 }
  0x8c   : > { %892 = vmatpush3.bf16.msra.mxu0 %v1003_v24 }
  0x8d   : > { %893 = vmatprep.subr.bf16.mxu0 %v1148_v0 }
  0x90   : > { %894 = vmatpush3.bf16.msra.mxu0 %v1004_v25 }
  0x91   : > { %895 = vmatprep.subr.bf16.mxu0 %v1148_v0 }
  0x94   : > { %896 = vmatpush3.bf16.msra.mxu0 %v1005_v33 }
 0x14a   : > { %v309_v27 = vpop.f32.mrb[0].mxu0 }
 0x14b   : > { %v310_v28 = vadd.f32 %v762_v26, %v309_v27  ;;  %v859_v29 = vpop.f32.mrb[1].mxu0 }
 0x14c   : > { %v312_v30 = vpop.f32.mrb[2].mxu0 }
 0x14d   : > { %v315_v31 = vpack.c.bf16 %v310_v28, %v310_v28  ;;  %v860_v32 = vpop.f32.mrb[3].mxu0 }
 0x14f   : > { %878 = vmatmul.mubr.bf16.vlgmr.msra.gmra.mrb[0].mxu1 %v315_v31 }
 0x150   : > { %917 = vmatprep.mubr.msk.bf16.mxu1 %vm1149_vm0, %v1148_v0  ;;  %902 = vmatpush3.bf16.msra.mxu1 %v1006_v34 }
 0x151   : > { %903 = vmatprep.subr.bf16.mxu1 %v1148_v0 }
 0x154   : > { %904 = vmatpush3.bf16.msra.mxu1 %v1007_v35 }
 0x155   : > { %905 = vmatprep.subr.bf16.mxu1 %v1148_v0 }
 0x158   : > { %906 = vmatpush3.bf16.msra.mxu1 %v1008_v36 }
 0x159   : > { %907 = vmatprep.subr.bf16.mxu1 %v1148_v0 }
 0x15c   : > { %908 = vmatpush3.bf16.msra.mxu1 %v1009_v37 }
 0x15d   : > { %909 = vmatprep.subr.bf16.mxu1 %v1148_v0 }
 0x160   : > { %910 = vmatpush3.bf16.msra.mxu1 %v1010_v38 }
 0x161   : > { %911 = vmatprep.subr.bf16.mxu1 %v1148_v0 }
 0x164   : > { %912 = vmatpush3.bf16.msra.mxu1 %v1011_v39 }
 0x165   : > { %913 = vmatprep.subr.bf16.mxu1 %v1148_v0 }
 0x168   : > { %914 = vmatpush3.bf16.msra.mxu1 %v1012_v40 }
 0x169   : > { %915 = vmatprep.subr.bf16.mxu1 %v1148_v0 }
 0x16c   : > { %916 = vmatpush3.bf16.msra.mxu1 %v1013_v48 }
 0x222   : > { %v423_v42 = vpop.f32.mrb[0].mxu1 }
 0x223   : > { %v424_v43 = vadd.f32 %v772_v41, %v423_v42  ;;  %v879_v44 = vpop.f32.mrb[1].mxu1 }
 0x224   : > { %v426_v45 = vpop.f32.mrb[2].mxu1 }
 0x225   : > { %v429_v46 = vpack.c.bf16 %v424_v43, %v424_v43  ;;  %v880_v47 = vpop.f32.mrb[3].mxu1 }
 0x227   : > { %898 = vmatmul.mubr.bf16.vlgmr.msra.gmra.mrb[4].mxu0 %v429_v46 }
 0x2fa   : > { %v537_v50 = vpop.f32.mrb[4].mxu0 }
 0x2fb   : > { %v538_v51 = vadd.f32 %v782_v49, %v537_v50  ;;  %v899_v52 = vpop.f32.mrb[5].mxu0 }
 0x2fc   : > { %v540_v53 = vpop.f32.mrb[6].mxu0 }
 0x2fd   : > { %v543_v54 = vpack.c.bf16 %v538_v51, %v538_v51  ;;  %v900_v55 = vpop.f32.mrb[7].mxu0 }
 0x2ff   : > { %918 = vmatmul.mubr.bf16.vlgmr.msra.gmra.mrb[4].mxu1 %v543_v54 }
 0x3d2   : > { %v651_v57 = vpop.f32.mrb[4].mxu1 }
 0x3d3   : > { %v652_v58 = vadd.f32 %v792_v56, %v651_v57  ;;  %v919_v59 = vpop.f32.mrb[5].mxu1 }
 0x3d4   : > { %v654_v60 = vpop.f32.mrb[6].mxu1 }
 0x3d5   : > { %657 = vst [vmem:[%s200_s11] sm:$0xff] %v652_v58  ;;  %v920_v61 = vpop.f32.mrb[7].mxu1 }
 0x3d6   : > { %1085 = shalt.err (!%p1082_p7)
}
 0x3d7   : > { %s1086_s30 = scalar_lea.hbm %s1382_s23, 128  ;;  %s1090_s25 = scalar_lea.hbm %s1429_s3, 256 }
 0x3d8   : > { %p1087_p9 = scmp.ne.s32.totalorder %s1382_s23, %s1086_s30  ;;  %p1091_p0 = scmp.lt.u32.totalorder %s1382_s23, %s1429_s3 }
 0x3d9   : > { %p1092_p11 = scmp.lt.u32.totalorder %s1090_s25, %s1086_s30  ;;  %p1094_p4 = scmp.lt.u32.totalorder %s1086_s30, %s1382_s23 }
 0x3da   : > { %p1088_p2 = pnand %p1087_p9, %p1262_p12 }
 0x3db   : > { %p1093_p1 = por %p1092_p11, %p1091_p0 }
 0x3dc   : > { %p1089_p5 = pneg %p1088_p2 }
 0x3dd   : > { %p1095_p6 = por %p1094_p4, %p1093_p1 }
 0x3df   : > { %p1096_p8 = pnand %p1095_p6, %p1089_p5 }
 0x3e1   : > { %1099 = shalt.err (!%p1096_p8)
}
 0x3e2   : > { %927 = dma.vmem_to_hbm [thread:$0]  (%p1262_p12), %s1384_s27, 128, %s1382_s23, %s659_s16  }
 0x3e3 PF: > { %s684_s8 = sand.u32 1, %s1130_s12   ;;  %p1444_p10 = scmp.ne.s32.totalorder %s1434_s19, 0 }
 0x3e4   : > { %p1445_p13 = scmp.ge.s32.totalorder %s1142_s15, 2  ;;  %s685_s9 = scalar_lea.sflag [#allocation4], %s684_s8 }
 0x3e6   : > { %p938_p3 = pnand %p1445_p13, %p1444_p10 }
 0x3e8   : > { %1125 = dma.done.wait (!%p938_p3), %s685_s9, 128  }
 0x3e9   : > { %1127 = vsyncadd (!%p938_p3), %s685_s9, 4294967168  ;;  %p17_p7 = scmp.ge.s32.totalorder %s1227_s24, 4   ;;  %s1446_s12 = smov %s1134_s13 }
 0x3ea   : > { %s1447_s13 = smov %s1138_s14  ;;  %s1448_s14 = smov %s1258_s17 }
 0x3eb   : > { %s1449_s15 = smov %s1227_s24  ;;  %19 = sbr.rel (!%p17_p7) target bundleno = 6 (0x6), region = 87 }
 0x3f2   :  { %690 = vsyncpa [#allocation3], 1 }
 0x3f3   :  { %692 = vsyncpa [#allocation3 + $0x1], 1 }
 0x3f4   :  { %693 = vsyncpa [#allocation6], 1 }
 0x3f5   :  { %694 = vsyncpa [#allocation4], 1 }
 0x3f6   :  { %696 = vsyncpa [#allocation4 + $0x1], 1 }

</bundles_post_ra>
